<compile_context>
chip_gen: v6e
topology: v6e:2x2x1
jax: 0.10.0
libtpu: 0.0.40
codegen_flags: <defaults>
</compile_context>

<pallas_src>
import functools

import jax
import jax.numpy as jnp
import numpy as np
from jax import lax
from jax.experimental import pallas as pl
from jax.experimental.pallas import tpu as pltpu


def _dam_kernel(pq_ref, pk_ref, pv_ref, vi_ref, gamma_ref, pkmax_ref, pkmin_ref,
                out_ref, acc_ref, *, tk_inner):
    """Grid = (batch, q_tile, kv_tile); kv is the (innermost) reduction axis."""
    b = pl.program_id(0)
    j = pl.program_id(2)

    @pl.when(j == 0)
    def _init():
        acc_ref[...] = jnp.zeros_like(acc_ref)

    pq = pq_ref[0]                                            # (TQ, 1) query projection (column)
    # Exact row max of the rank-1 energy pq_i * pk_j from two per-batch SMEM scalars.
    m = jnp.maximum(pq * pkmax_ref[b], pq * pkmin_ref[b])     # (TQ, 1)

    tk_block = pk_ref.shape[-1]
    n_chunks = tk_block // tk_inner

    acc = acc_ref[...]                                        # (C+1, TQ) f32
    # Static trip count -> fully unrolled straight-line code with static lane slices.
    for c in range(n_chunks):
        sl = pl.ds(c * tk_inner, tk_inner)
        pk_row = pk_ref[0, :, sl]                             # (1, TK_INNER), lane-dense
        pv_t = pv_ref[0, :, sl]                               # (C+1, TK_INNER), row C == 1
        # Energy chunk as a VPU broadcast outer product; EUP exp with exponents <= 0.
        e = jnp.exp(pq * pk_row - m)                          # (TQ, TK_INNER), f32
        # One NT MXU matmul yields the weighted values (rows 0..C-1) AND the softmax
        # row sums (row C, from the all-ones channel), accumulated in f32.
        acc = acc + lax.dot_general(
            pv_t.astype(jnp.bfloat16), e.astype(jnp.bfloat16),
            dimension_numbers=(((1,), (1,)), ((), ())),
            preferred_element_type=jnp.float32)               # (C+1, TQ)
    acc_ref[...] = acc

    @pl.when(j == pl.num_programs(2) - 1)
    def _finalize():
        c_dim = vi_ref.shape[1]
        acc_f = acc_ref[...]
        rsum = acc_f[c_dim:c_dim + 1, :]                      # (1, TQ) softmax denominator
        scale = gamma_ref[0] * pl.reciprocal(rsum, approx=True)
        out_ref[0] = (acc_f[:c_dim, :] * scale + vi_ref[0]).astype(out_ref.dtype)


def dam_module_forward(q, k, v, params, *, tq=512, tk=512, tk_inner=128):
    """q, k, v: (B, C, L, H, W) float32. params in PyTorch Conv3d (out, in) layout."""
    B, C, L, H, W = q.shape
    N = L * H * W
    wq_t, bq, wk_t, bk, wv_t, bv, gamma_x = params

    # Channels-first, lane-dense flattening: pure reshape, no HBM transpose.
    qf = q.reshape(B, C, N)
    kf = k.reshape(B, C, N)
    vf = v.reshape(B, C, N)

    # query/key 1x1x1 convs (C -> 1): rank-1 projections, O(B*N*C).
    pq = jnp.einsum('c,bcn->bn', wq_t[0], qf) + bq[0]         # (B, N)
    pk = jnp.einsum('c,bcn->bn', wk_t[0], kf) + bk[0]         # (B, N)
    pk_max = jnp.max(pk, axis=-1)                             # (B,)
    pk_min = jnp.min(pk, axis=-1)                             # (B,)
    pq3 = pq.reshape(B, N, 1)      # column tiles (TQ, 1): fetched once per q tile
    pk3 = pk.reshape(B, 1, N)      # lane-dense row: contiguous DMA on the kv stream

    # value_conv (3C -> C) hoisted out of the kernel, split by the torch cat order
    # (v, q, k).  An all-ones channel is appended so the kernel's single matmul also
    # produces the softmax row sums in the right (lane-dense) layout.
    wv_v, wv_q, wv_k = wv_t[:, :C], wv_t[:, C:2 * C], wv_t[:, 2 * C:]
    pv = (jnp.einsum('oc,bcn->bon', wv_v, vf)
          + jnp.einsum('oc,bcn->bon', wv_q, qf)
          + jnp.einsum('oc,bcn->bon', wv_k, kf)
          + bv[None, :, None])                                # (B, C, N)
    pv_aug = jnp.concatenate([pv, jnp.ones((B, 1, N), pv.dtype)], axis=1)   # (B, C+1, N)

    gamma = jnp.reshape(jnp.asarray(gamma_x, jnp.float32), (1,))

    tq = min(tq, N)
    tk = min(tk, N)
    tk_inner = min(tk_inner, tk)
    assert N % tq == 0 and N % tk == 0 and tk % tk_inner == 0, \
        "L*H*W must be divisible by the tile sizes"
    assert (tq % 128 == 0 or tq == N) and (tk_inner % 128 == 0 or tk_inner == N), \
        "tiles must be lane-aligned (multiple of 128) or cover all of N"
    n_q, n_kv = N // tq, N // tk

    smem = pl.BlockSpec(memory_space=pltpu.MemorySpace.SMEM)

    out_flat = pl.pallas_call(
        functools.partial(_dam_kernel, tk_inner=tk_inner),
        out_shape=jax.ShapeDtypeStruct((B, C, N), jnp.float32),
        grid_spec=pltpu.PrefetchScalarGridSpec(
            num_scalar_prefetch=0,
            grid=(B, n_q, n_kv),
            in_specs=[
                pl.BlockSpec((1, tq, 1), lambda b, i, j: (b, i, 0)),      # pq  (q tile, column)
                pl.BlockSpec((1, 1, tk), lambda b, i, j: (b, 0, j)),      # pk  (kv tile, lane-dense)
                pl.BlockSpec((1, C + 1, tk), lambda b, i, j: (b, 0, j)),  # pv + ones (kv tile)
                pl.BlockSpec((1, C, tq), lambda b, i, j: (b, 0, i)),      # v   (q tile, residual)
                smem, smem, smem,                                         # gamma, pk_max, pk_min
            ],
            out_specs=pl.BlockSpec((1, C, tq), lambda b, i, j: (b, 0, i)),
            scratch_shapes=[pltpu.VMEM((C + 1, tq), jnp.float32)],        # acc (+ row sums in row C)
        ),
        compiler_params=pltpu.CompilerParams(
            dimension_semantics=("parallel", "parallel", "arbitrary"),
            vmem_limit_bytes=32 * 1024 * 1024,
        ),
    )(pq3, pk3, pv_aug, vf, gamma, pk_max, pk_min)

    return out_flat.reshape(B, C, L, H, W)


def dam_reference(q, k, v, params):
    """Plain-JAX mirror of the PyTorch forward for verification."""
    wq_t, bq, wk_t, bk, wv_t, bv, gamma_x = params
    B, C, L, H, W = q.shape
    N = L * H * W
    qf = q.reshape(B, C, N)
    kf = k.reshape(B, C, N)
    vf = v.reshape(B, C, N)
    proj_query = jnp.einsum('oc,bcn->bon', wq_t, qf) + bq[None, :, None]   # (B, 1, N)
    proj_key = jnp.einsum('oc,bcn->bon', wk_t, kf) + bk[None, :, None]     # (B, 1, N)
    energy = jnp.matmul(jnp.transpose(proj_query, (0, 2, 1)), proj_key)    # (B, N, N)
    attn = jax.nn.softmax(energy, axis=-1)
    cat = jnp.concatenate([vf, qf, kf], axis=1)                            # (B, 3C, N)
    pv = jnp.einsum('oc,bcn->bon', wv_t, cat) + bv[None, :, None]          # (B, C, N)
    out = jnp.einsum('bcn,bmn->bcm', pv, attn)                             # (B, C, N)
    out = gamma_x.reshape(()) * out + vf
    return out.reshape(B, C, L, H, W)


if __name__ == "__main__":
    # N = L*H*W = 512 so that tq=tk=256, tk_inner=128 exercises multiple q tiles,
    # multiple kv grid steps (cross-step accumulation) and multiple in-kernel kv chunks.
    B, C, L, H, W = 2, 4, 4, 8, 16
    key = jax.random.PRNGKey(0)
    ks = jax.random.split(key, 9)

    q = jax.random.normal(ks[0], (B, C, L, H, W), jnp.float32)
    k = jax.random.normal(ks[1], (B, C, L, H, W), jnp.float32)
    v = jax.random.normal(ks[2], (B, C, L, H, W), jnp.float32)

    # Parameters in PyTorch Conv3d layout (kernel_size=1, squeezed): weight (out, in), bias (out,)
    wq_t = 0.5 * jax.random.normal(ks[3], (1, C), jnp.float32)
    bq = 0.1 * jax.random.normal(ks[4], (1,), jnp.float32)
    wk_t = 0.5 * jax.random.normal(ks[5], (1, C), jnp.float32)
    bk = 0.1 * jax.random.normal(ks[6], (1,), jnp.float32)
    wv_t = 0.3 * jax.random.normal(ks[7], (C, 3 * C), jnp.float32)
    bv = 0.1 * jax.random.normal(ks[8], (C,), jnp.float32)
    # torch init is zeros(1); use a nonzero value so the attention path is exercised.
    gamma_x = jnp.array([0.5], jnp.float32)

    params = (wq_t, bq, wk_t, bk, wv_t, bv, gamma_x)
    ref = dam_reference(q, k, v, params)

    # Fully tiled path: grid (B, 2, 2), 2 kv sub-chunks per grid step.
    out = dam_module_forward(q, k, v, params, tq=256, tk=256, tk_inner=128)
    jax.block_until_ready(out)
    # Tolerance accounts for the bf16 MXU inputs and the approx reciprocal.
    np.testing.assert_allclose(np.asarray(out), np.asarray(ref), rtol=2e-2, atol=2e-2)

    # Default (large-tile) path: tiles cap at N -> grid (B, 1, 1), 4 kv sub-chunks.
    out_def = dam_module_forward(q, k, v, params)
    jax.block_until_ready(out_def)
    np.testing.assert_allclose(np.asarray(out_def), np.asarray(ref), rtol=2e-2, atol=2e-2)

    print("KERNEL_OK")
</pallas_src>

<mosaic_0001>
module attributes {stable_mosaic.version = 11 : i64} {
  func.func @_dam_kernel(%arg0: i32, %arg1: i32, %arg2: i32, %arg3: memref<1x256x1xf32, #tpu.memory_space<vmem>>, %arg4: memref<1x1x256xf32, #tpu.memory_space<vmem>>, %arg5: memref<1x5x256xf32, #tpu.memory_space<vmem>>, %arg6: memref<1x4x256xf32, #tpu.memory_space<vmem>>, %arg7: memref<1xf32, #tpu.memory_space<smem>>, %arg8: memref<2xf32, #tpu.memory_space<smem>>, %arg9: memref<2xf32, #tpu.memory_space<smem>>, %arg10: memref<1x4x256xf32, #tpu.memory_space<vmem>>, %arg11: memref<5x256xf32, #tpu.memory_space<vmem>>) attributes {dimension_semantics = [#tpu.dimension_semantics<parallel>, #tpu.dimension_semantics<parallel>, #tpu.dimension_semantics<arbitrary>], iteration_bounds = array<i64: 2, 2, 2>, scalar_prefetch = 0 : i64, scratch_operands = 1 : i64, tpu.core_type = #tpu.core_type<tc>, window_params = [{transform_indices = @transform_0, window_bounds = array<i64: 1, 256, 1>}, {transform_indices = @transform_1, window_bounds = array<i64: 1, 1, 256>}, {transform_indices = @transform_2, window_bounds = array<i64: 1, 5, 256>}, {transform_indices = @transform_3, window_bounds = array<i64: 1, 4, 256>}, {transform_indices = @transform_4, window_bounds = array<i64: 1>}, {transform_indices = @transform_5, window_bounds = array<i64: 2>}, {transform_indices = @transform_6, window_bounds = array<i64: 2>}, {transform_indices = @transform_7, window_bounds = array<i64: 1, 4, 256>}]} {
    %c0_i32 = arith.constant 0 : i32
    %0 = arith.cmpi eq, %arg2, %c0_i32 : i32
    %1 = arith.extui %0 : i1 to i32
    %c0_i32_0 = arith.constant 0 : i32
    %2 = arith.cmpi ne, %1, %c0_i32_0 : i32
    scf.if %2 {
      %cst_20 = arith.constant 0.000000e+00 : f32
      %47 = vector.broadcast %cst_20 : f32 to vector<5x256xf32>
      %c0_21 = arith.constant 0 : index
      %c0_22 = arith.constant 0 : index
      %48 = vector.load %arg11[%c0_21, %c0_22] : memref<5x256xf32, #tpu.memory_space<vmem>>, vector<5x256xf32>
      tpu.vector_store %arg11[%c0_21, %c0_22], %47 {strides = array<i32>} : memref<5x256xf32, #tpu.memory_space<vmem>>, vector<5x256xf32>,
    } else {
    }
    %c0 = arith.constant 0 : index
    %c0_1 = arith.constant 0 : index
    %c0_2 = arith.constant 0 : index
    %3 = vector.load %arg3[%c0, %c0_1, %c0_2] : memref<1x256x1xf32, #tpu.memory_space<vmem>>, vector<1x256x1xf32>
    %4 = vector.shape_cast %3 : vector<1x256x1xf32> to vector<256x1xf32>
    %5 = arith.index_cast %arg0 : i32 to index
    %6 = memref.load %arg8[%5] : memref<2xf32, #tpu.memory_space<smem>>
    %7 = vector.broadcast %6 : f32 to vector<256x1xf32>
    %8 = arith.mulf %4, %7 : vector<256x1xf32>
    %9 = arith.index_cast %arg0 : i32 to index
    %10 = memref.load %arg9[%9] : memref<2xf32, #tpu.memory_space<smem>>
    %11 = vector.broadcast %10 : f32 to vector<256x1xf32>
    %12 = arith.mulf %4, %11 : vector<256x1xf32>
    %13 = arith.maximumf %8, %12 : vector<256x1xf32>
    %c0_3 = arith.constant 0 : index
    %c0_4 = arith.constant 0 : index
    %14 = vector.load %arg11[%c0_3, %c0_4] : memref<5x256xf32, #tpu.memory_space<vmem>>, vector<5x256xf32>
    %c0_5 = arith.constant 0 : index
    %c0_6 = arith.constant 0 : index
    %c0_7 = arith.constant 0 : index
    %15 = vector.load %arg4[%c0_5, %c0_6, %c0_7] : memref<1x1x256xf32, #tpu.memory_space<vmem>>, vector<1x1x128xf32>
    %16 = vector.shape_cast %15 : vector<1x1x128xf32> to vector<1x128xf32>
    %c0_8 = arith.constant 0 : index
    %c0_9 = arith.constant 0 : index
    %c0_10 = arith.constant 0 : index
    %17 = vector.load %arg5[%c0_8, %c0_9, %c0_10] : memref<1x5x256xf32, #tpu.memory_space<vmem>>, vector<1x5x128xf32>
    %18 = vector.shape_cast %17 : vector<1x5x128xf32> to vector<5x128xf32>
    %19 = vector.broadcast %4 : vector<256x1xf32> to vector<256x128xf32>
    %20 = vector.broadcast %16 : vector<1x128xf32> to vector<256x128xf32>
    %21 = arith.mulf %19, %20 : vector<256x128xf32>
    %22 = vector.broadcast %13 : vector<256x1xf32> to vector<256x128xf32>
    %23 = arith.subf %21, %22 : vector<256x128xf32>
    %24 = math.exp %23 : vector<256x128xf32>
    %25 = arith.truncf %18 : vector<5x128xf32> to vector<5x128xbf16>
    %26 = arith.truncf %24 : vector<256x128xf32> to vector<256x128xbf16>
    %cst = arith.constant dense<0.000000e+00> : vector<5x256xf32>
    %27 = tpu.matmul %25, %26, %cst {dimension_numbers = #tpu.dot_dimension_numbers<[1], [1], [0], [0], [0, 0, 1, 0], [], []>} : vector<5x128xbf16>, vector<256x128xbf16>, vector<5x256xf32> -> vector<5x256xf32>
    %28 = arith.addf %14, %27 : vector<5x256xf32>
    %c0_11 = arith.constant 0 : index
    %c0_12 = arith.constant 0 : index
    %c128 = arith.constant 128 : index
    %29 = vector.load %arg4[%c0_11, %c0_12, %c128] : memref<1x1x256xf32, #tpu.memory_space<vmem>>, vector<1x1x128xf32>
    %30 = vector.shape_cast %29 : vector<1x1x128xf32> to vector<1x128xf32>
    %c0_13 = arith.constant 0 : index
    %c0_14 = arith.constant 0 : index
    %c128_15 = arith.constant 128 : index
    %31 = vector.load %arg5[%c0_13, %c0_14, %c128_15] : memref<1x5x256xf32, #tpu.memory_space<vmem>>, vector<1x5x128xf32>
    %32 = vector.shape_cast %31 : vector<1x5x128xf32> to vector<5x128xf32>
    %33 = vector.broadcast %4 : vector<256x1xf32> to vector<256x128xf32>
    %34 = vector.broadcast %30 : vector<1x128xf32> to vector<256x128xf32>
    %35 = arith.mulf %33, %34 : vector<256x128xf32>
    %36 = vector.broadcast %13 : vector<256x1xf32> to vector<256x128xf32>
    %37 = arith.subf %35, %36 : vector<256x128xf32>
    %38 = math.exp %37 : vector<256x128xf32>
    %39 = arith.truncf %32 : vector<5x128xf32> to vector<5x128xbf16>
    %40 = arith.truncf %38 : vector<256x128xf32> to vector<256x128xbf16>
    %cst_16 = arith.constant dense<0.000000e+00> : vector<5x256xf32>
    %41 = tpu.matmul %39, %40, %cst_16 {dimension_numbers = #tpu.dot_dimension_numbers<[1], [1], [0], [0], [0, 0, 1, 0], [], []>} : vector<5x128xbf16>, vector<256x128xbf16>, vector<5x256xf32> -> vector<5x256xf32>
    %42 = arith.addf %28, %41 : vector<5x256xf32>
    %c0_17 = arith.constant 0 : index
    %c0_18 = arith.constant 0 : index
    %43 = vector.load %arg11[%c0_17, %c0_18] : memref<5x256xf32, #tpu.memory_space<vmem>>, vector<5x256xf32>
    tpu.vector_store %arg11[%c0_17, %c0_18], %42 {strides = array<i32>} : memref<5x256xf32, #tpu.memory_space<vmem>>, vector<5x256xf32>,
    %c1_i32 = arith.constant 1 : i32
    %44 = arith.cmpi eq, %arg2, %c1_i32 : i32
    %45 = arith.extui %44 : i1 to i32
    %c0_i32_19 = arith.constant 0 : i32
    %46 = arith.cmpi ne, %45, %c0_i32_19 : i32
    scf.if %46 {
      %c0_20 = arith.constant 0 : index
      %c0_21 = arith.constant 0 : index
      %47 = vector.load %arg11[%c0_20, %c0_21] : memref<5x256xf32, #tpu.memory_space<vmem>>, vector<5x256xf32>
      %48 = vector.extract_strided_slice %47 {offsets = [4, 0], sizes = [1, 256], strides = [1, 1]} : vector<5x256xf32> to vector<1x256xf32>
      %c0_22 = arith.constant 0 : index
      %49 = memref.load %arg7[%c0_22] : memref<1xf32, #tpu.memory_space<smem>>
      %50 = tpu.reciprocal %48 {approx = true} : vector<1x256xf32> -> vector<1x256xf32>
      %51 = vector.broadcast %49 : f32 to vector<1x256xf32>
      %52 = arith.mulf %51, %50 : vector<1x256xf32>
      %53 = vector.extract_strided_slice %47 {offsets = [0, 0], sizes = [4, 256], strides = [1, 1]} : vector<5x256xf32> to vector<4x256xf32>
      %54 = vector.broadcast %52 : vector<1x256xf32> to vector<4x256xf32>
      %55 = arith.mulf %53, %54 : vector<4x256xf32>
      %c0_23 = arith.constant 0 : index
      %c0_24 = arith.constant 0 : index
      %c0_25 = arith.constant 0 : index
      %56 = vector.load %arg6[%c0_23, %c0_24, %c0_25] : memref<1x4x256xf32, #tpu.memory_space<vmem>>, vector<1x4x256xf32>
      %57 = vector.shape_cast %56 : vector<1x4x256xf32> to vector<4x256xf32>
      %58 = arith.addf %55, %57 : vector<4x256xf32>
      %c0_26 = arith.constant 0 : index
      %c0_27 = arith.constant 0 : index
      %c0_28 = arith.constant 0 : index
      %59 = vector.load %arg10[%c0_26, %c0_27, %c0_28] : memref<1x4x256xf32, #tpu.memory_space<vmem>>, vector<1x4x256xf32>
      %60 = vector.shape_cast %59 : vector<1x4x256xf32> to vector<4x256xf32>
      %61 = vector.shape_cast %58 : vector<4x256xf32> to vector<1x4x256xf32>
      tpu.vector_store %arg10[%c0_26, %c0_27, %c0_28], %61 {strides = array<i32>} : memref<1x4x256xf32, #tpu.memory_space<vmem>>, vector<1x4x256xf32>,
    } else {
    }
    return
  }
  func.func @transform_0(%arg0: i32, %arg1: i32, %arg2: i32) -> (i32, i32, i32) {
    %c0_i32 = arith.constant 0 : i32
    %c0_i32_0 = arith.constant 0 : i32
    return %arg0, %arg1, %c0_i32 : i32, i32, i32
  }
  func.func @transform_1(%arg0: i32, %arg1: i32, %arg2: i32) -> (i32, i32, i32) {
    %c0_i32 = arith.constant 0 : i32
    %c0_i32_0 = arith.constant 0 : i32
    return %arg0, %c0_i32, %arg2 : i32, i32, i32
  }
  func.func @transform_2(%arg0: i32, %arg1: i32, %arg2: i32) -> (i32, i32, i32) {
    %c0_i32 = arith.constant 0 : i32
    %c0_i32_0 = arith.constant 0 : i32
    return %arg0, %c0_i32, %arg2 : i32, i32, i32
  }
  func.func @transform_3(%arg0: i32, %arg1: i32, %arg2: i32) -> (i32, i32, i32) {
    %c0_i32 = arith.constant 0 : i32
    %c0_i32_0 = arith.constant 0 : i32
    return %arg0, %c0_i32, %arg1 : i32, i32, i32
  }
  func.func @transform_4(%arg0: i32, %arg1: i32, %arg2: i32) -> i32 {
    %c0_i32 = arith.constant 0 : i32
    %c0_i32_0 = arith.constant 0 : i32
    return %c0_i32 : i32
  }
  func.func @transform_5(%arg0: i32, %arg1: i32, %arg2: i32) -> i32 {
    %c0_i32 = arith.constant 0 : i32
    %c0_i32_0 = arith.constant 0 : i32
    return %c0_i32 : i32
  }
  func.func @transform_6(%arg0: i32, %arg1: i32, %arg2: i32) -> i32 {
    %c0_i32 = arith.constant 0 : i32
    %c0_i32_0 = arith.constant 0 : i32
    return %c0_i32 : i32
  }
  func.func @transform_7(%arg0: i32, %arg1: i32, %arg2: i32) -> (i32, i32, i32) {
    %c0_i32 = arith.constant 0 : i32
    %c0_i32_0 = arith.constant 0 : i32
    return %arg0, %c0_i32, %arg1 : i32, i32, i32
  }
}

</mosaic_0001>

<bundles_post_ra>
// kernel: tpu_custom_call.1
= control target key start
LH: loop header
LB: loop body
LE: loop exit
PB: predicated region body
PF: predicated region fallthrough
CT: control target
= control target key end

     0   :  { %s2661_s0 = inlined_call_operand.vmem [shape: f32[2,512,1], index: 0, kind: input, shape index: {}]   ;;  %s2662_s1 = inlined_call_operand.vmem [shape: f32[2,1,512], index: 1, kind: input, shape index: {}]   ;;  %s2663_s2 = inlined_call_operand.vmem [shape: f32[2,5,512], index: 2, kind: input, shape index: {}]   ;;  %s2664_s3 = inlined_call_operand.vmem [shape: f32[2,4,512], index: 3, kind: input, shape index: {}]   ;;  %s2665_s4 = inlined_call_operand.<no memory space> [shape: f32[1], index: 4, kind: input, shape index: {}]   ;;  %s2666_s5 = inlined_call_operand.vmem [shape: f32[2], index: 5, kind: input, shape index: {}]   ;;  %s2667_s6 = inlined_call_operand.vmem [shape: f32[2], index: 6, kind: input, shape index: {}]   ;;  %s2668_s7 = inlined_call_operand.hbm [shape: f32[2,4,512], index: 7, kind: output, shape index: {}]  }
   0x1   :  { %2684 = sst [smem:[#allocation24_spill]] %s2661_s0 }
   0x2   :  { %2685 = sst [smem:[#allocation25_spill]] %s2666_s5 }
   0x3   :  { %2686 = sst [smem:[#allocation26_spill]] %s2667_s6 }
   0x4   :  { %12 = sst [smem:[#allocation3]] %s2665_s4 }
   0x5   :  { %13 = vsyncpa [#allocation6], 0 }
   0x6   :  { %14 = vsyncpa [#allocation8], 0 }
   0x7   :  { %15 = vsyncpa [#allocation5], 0 }
   0x8   :  { %17 = vsyncpa [#allocation5 + $0x1], 0  ;;  %s2019_s26 = smov 0   ;;  %s2021_s27 = smov 0  }
   0x9   :  { %s2023_s28 = smov 0   ;;  %s2025_s29 = smov 0  }
   0xa   :  { %s2027_s30 = smov 0   ;;  %s2029_s8 = smov 0  }
   0xb   :  { %s2031_s9 = smov 0   ;;  %s2033_s10 = smov 0  }
   0xc   :  { %s2035_s4 = smov 0   ;;  %s2037_s11 = smov 0  }
   0xd LB: > { %2687 = sst [smem:[#allocation13_spill]] %s1957_s9  ;;  %s1511_s12 = sadd.s32 4294967295, %s1969_s11   ;;  %s1969_s11 = sphi %s2037_s11, %s23_s11   ;;  %s1965_s4 = sphi %s2035_s4, %s2737_s4   ;;  %s1961_s10 = sphi %s2033_s10, %s2736_s10   ;;  %s1957_s9 = sphi %s2031_s9, %s2735_s9   ;;  %s1953_s8 = sphi %s2029_s8, %s2734_s8   ;;  %s1949_s30 = sphi %s2027_s30, %s2733_s30   ;;  %s1945_s29 = sphi %s2025_s29, %s2732_s29   ;;  %s1941_s28 = sphi %s2023_s28, %s2740_s28   ;;  %s1937_s27 = sphi %s2021_s27, %s2739_s27   ;;  %s1933_s26 = sphi %s2019_s26, %s2738_s26  }
   0xe   : > { %2688 = sst [smem:[#allocation14_spill]] %s1961_s10  ;;  %s1512_s13 = sadd.s32 4294967294, %s1969_s11  }
   0xf   : > { %2689 = sst [smem:[#allocation15_spill]] %s1965_s4  ;;  %s35_s14 = sadd.s32 1, %s1957_s9 }
  0x10   : > { %s38_s15 = sadd.s32 1, %s1961_s10  ;;  %p36_p0 = scmp.ge.s32.totalorder %s35_s14, 2 }
  0x11   : > { %s42_s16 = sadd.s32 1, %s1965_s4  ;;  %s226_s17 = sadd.s32 1, %s1941_s28 }
  0x12   : > { %p236_p1 = scmp.ne.s32.totalorder %s1941_s28, %s1937_s27  ;;  %s2742_s14 = smov (%p36_p0, %s35_s14), 0 }
  0x13   : > { %2690 = sst [smem:[#allocation16_spill]] %s2742_s14  ;;  %s2744_s15 = smov (!%p36_p0, %s38_s15), %s1961_s10 }
  0x14   : > { %p237_p2 = scmp.eq.s32.totalorder %s1511_s12, 7  ;;  %p242_p3 = scmp.ne.s32.totalorder %s1937_s27, %s1933_s26 }
  0x15   : > { %p40_p4 = scmp.ge.s32.totalorder %s2744_s15, 2  ;;  %p243_p5 = scmp.eq.s32.totalorder %s1512_s13, 7 }
  0x16   : > { %p2082_p6 = por %p237_p2, %p236_p1  ;;  %p1513_p7 = scmp.ge.s32.totalorder %s1969_s11, 1 }
  0x17   : > { %s2746_s15 = smov (%p40_p4, %s2744_s15), 0  ;;  %s2748_s16 = smov (!%p40_p4, %s42_s16), %s1965_s4 }
  0x18   : > { %s2691_s18 = scalar_select %p2082_p6, 1, 0 }
  0x19   : > { %2692 = sst [smem:[#allocation17_spill]] %s2746_s15  ;;  %s222_s19 = ssub.s32 %s1961_s10, %s2746_s15 }
  0x1a   : > { %p2092_p8 = por %p243_p5, %p242_p3  ;;  %p44_p9 = scmp.ge.s32.totalorder %s2748_s16, 2 }
  0x1b   : > { %p250_p10 = scmp.lt.s32.totalorder %s1969_s11, 9  ;;  %p2097_p11 = scmp.eq.s32.totalorder %s1511_s12, 0 }
  0x1c   : > { %s2693_s20 = scalar_select %p2092_p8, 1, 0 }
  0x1d   : > { %s2695_s21 = scalar_select %p2097_p11, 1, 0 }
  0x1e   : > { %2694 = sst [smem:[#allocation18_spill]] %s2693_s20  ;;  %s2750_s16 = smov (%p44_p9, %s2748_s16), 0 }
  0x1f   : > { %2696 = sst [smem:[#allocation19_spill]] %s2750_s16  ;;  %p2103_p12 = pnand %p1513_p7, %p250_p10 }
  0x20   : > { %s2698_s5 = sld [smem:[#allocation25_spill]]  ;;  %s221_s13 = ssub.s32 %s1965_s4, %s2750_s16 }
  0x21   : > { %s2697_s22 = scalar_select %p2103_p12, 1, 0 }
  0x22   : > { %s223_s15 = sor.u32 %s222_s19, %s221_s13  ;;  %p1588_p13 = pneg %p2103_p12 }
  0x23   : > { %p224_p0 = scmp.eq.s32.totalorder %s223_s15, 0  ;;  %s2700_s6 = sld [smem:[#allocation26_spill]] }
  0x24   : > { %p2116_p1 = pnand %p2097_p11, %p1588_p13 }
  0x25   : > { %s2124_s20 = scalar_select %p224_p0, %s1941_s28, %s226_s17  }
  0x26   : > { %s266_s25 = sshll.u32 %s2698_s5, 4  ;;  %p1825_p3 = pneg %p2116_p1  ;;  %s267_s25 = int_to_ptr.vmem [resolvable:$true] %s266_s25 }
  0x27   : > { %s1823_s23 = scalar_lea.vmem %s267_s25, 16  ;;  %p1831_p7 = scmp.lt.s32.totalorder %s267_s25, %s267_s25 }
  0x28   : > { %p1824_p2 = scmp.ne.s32.totalorder %s267_s25, %s1823_s23  ;;  %p1832_p9 = scmp.lt.s32.totalorder %s1823_s23, %s1823_s23 }
  0x29   : > { %s277_s9 = sshll.u32 %s2700_s6, 4  ;;  %s278_s9 = int_to_ptr.vmem [resolvable:$true] %s277_s9 }
  0x2a   : > { %p1826_p4 = pnand %p1825_p3, %p1824_p2  ;;  %p1833_p10 = por %p1832_p9, %p1831_p7 }
  0x2c   : > { %p1827_p5 = pneg %p1826_p4 }
  0x2e   : > { %p1834_p13 = pnand %p1833_p10, %p1827_p5 }
  0x30   : > { %1837 = shalt.err (!%p1834_p13)
}
  0x31   : > { %s1971_s15 = smov [#allocation4]   ;;  %s1838_s10 = scalar_lea.vmem %s278_s9, 16 }
  0x32   : > { %1591 = dma.vmem_to_smem (!%p2116_p1), %s267_s25, 16, %s1971_s15, [#allocation6]  }
  0x33   : > { %p1839_p8 = scmp.ne.s32.totalorder %s278_s9, %s1838_s10  ;;  %p1846_p11 = scmp.lt.s32.totalorder %s278_s9, %s278_s9 }
  0x34   : > { %p1847_p12 = scmp.lt.s32.totalorder %s1838_s10, %s1838_s10 }
  0x35   : > { %p1841_p0 = pnand %p1839_p8, %p1825_p3 }
  0x36   : > { %p1848_p2 = por %p1847_p12, %p1846_p11 }
  0x37   : > { %p1842_p6 = pneg %p1841_p0 }
  0x39   : > { %p1849_p4 = pnand %p1848_p2, %p1842_p6 }
  0x3b   : > { %1852 = shalt.err (!%p1849_p4)
}
  0x3c   : > { %s1972_s14 = smov [#allocation7]   ;;  %p2701_p5 = scmp.ne.s32.totalorder %s2697_s22, 0 }
  0x3d   : > { %1594 = dma.vmem_to_smem (!%p2116_p1), %s278_s9, 16, %s1972_s14, [#allocation8]  }
  0x3e   : > { %341 = sbr.rel (%p2701_p5) target bundleno = 634 (0x27a), region = 48 }
  0x43   : > { %p2702_p7 = scmp.ne.s32.totalorder %s2695_s21, 0 }
  0x45   : > { %1920 = dma.done.wait (%p2702_p7), [#allocation6], 16  }
  0x46   : > { %1922 = vsyncadd (%p2702_p7), [#allocation6], 4294967280 }
  0x47   : > { %1924 = dma.done.wait (%p2702_p7), [#allocation8], 16  }
  0x48   : > { %1926 = vsyncadd (%p2702_p7), [#allocation8], 4294967280 }
  0x49   : > { %351 = sfence }
  0x4a   : > { %s2677_s9 = sand.u32 1, %s1937_s27   ;;  %s1521_s17 = sshll.u32 %s1949_s30, 5 }
  0x4b   : > { %s2146_s19 = sshll.u32 %s2677_s9, 3  ;;  %p409_p6 = scmp.lt.s32.totalorder %s1953_s8, 1 }
  0x4c   : > { %p411_p8 = scmp.lt.s32.totalorder %s1521_s17, 63  ;;  %s1524_s21 = sshll.u32 %s1945_s29, 1 }
  0x4d   : > { %s410_s22 = scalar_select %p409_p6, %s1953_s8, 1 }
  0x4e   : > { %s2752_s17 = smov (!%p411_p8, %s1521_s17), 63  ;;  %p421_p11 = scmp.lt.s32.totalorder %s1524_s21, 3 }
  0x4f   : > { %s1522_s24 = sshll.u32 %s410_s22, 6  ;;  %s1525_s12 = sshll.u32 %s410_s22, 2 }
  0x50   : > { %s414_s25 = sadd.s32 %s1522_s24, %s2752_s17  ;;  %s2703_s0 = sld [smem:[#allocation24_spill]] }
  0x51   : > { %s1523_s13 = sshll.u32 %s414_s25, 3  ;;  %s2157_s14 = sshll.u32 %s1949_s30, 1 }
  0x52   : > { %s2754_s21 = smov (!%p421_p11, %s1524_s21), 3  ;;  %p440_p12 = scmp.lt.s32.totalorder %s2157_s14, 3 }
  0x53   : > { %s424_s9 = sadd.s32 %s1525_s12, %s2754_s21  ;;  %s407_s21 = scalar_lea.vmem [#allocation9], %s2146_s19 }
  0x54   : > { %s2163_s17 = scalar_lea.vmem %s2662_s1, %s424_s9  ;;  %s1528_s24 = sshll.u32 %s424_s9, 3 }
  0x55   : > { %s2168_s16 = scalar_lea.vmem %s2663_s2, %s1528_s24  ;;  %p1532_p1 = scmp.ne.s32.totalorder %s1945_s29, 0 }
  0x56   : > { %s2154_s10 = scalar_lea.vmem %s2703_s0, %s1523_s13 }
  0x57   : > { %s441_s13 = scalar_select %p440_p12, %s2157_s14, 3 }
  0x58   : > { %452 = sbr.rel (%p1532_p1) target bundleno = 95 (0x5f), region = 60 }
  0x59   : > { %s443_s23 = sadd.s32 %s1525_s12, %s441_s13 }
  0x5a   : > { %s1531_s30 = sshll.u32 %s443_s23, 2 }
  0x5b   : > { %s2174_s4 = scalar_lea.vmem %s2664_s3, %s1531_s30 }
  0x5d   : > { %v1973_v0 = vmov 0.0  }
  0x5e   : > { %453 = vst [vmem:[#allocation2] sm:$0x1f] %v1973_v0  ;;  %454 = vst [vmem:[#allocation2 + $0x8] sm:$0x1f] %v1973_v0 }
  0x5f PF: > { %v485_v1 = vld [vmem:[%s2154_s10 + $0xf0] sm:$0xff]  ;;  %s487_s5 = sld [smem:[#allocation4 + %s1953_s8]]  ;;  %v1974_v3 = vmov 0   ;;  %v486_v4 = vld [vmem:[%s2154_s10 + $0xf8] sm:$0xff]  ;;  %v484_v20 = vld [vmem:[%s2154_s10 + $0xe8] sm:$0xff]  ;;  %p1535_p3 = scmp.ne.s32.totalorder %s1945_s29, 1 }
  0x60   : > { %v469_v2 = vld [vmem:[%s2154_s10 + $0x70] sm:$0xff]  ;;  %1689 = vset.pattern.permute.xlu1 %v1974_v3  ;;  %1688 = vset.pattern.permute.xlu0 %v1974_v3  ;;  %s521_s0 = sld [smem:[#allocation7 + %s1953_s8]]  ;;  %v470_v5 = vld [vmem:[%s2154_s10 + $0x78] sm:$0xff]  ;;  %v483_v23 = vld [vmem:[%s2154_s10 + $0xe0] sm:$0xff] }
  0x61   : > { %743 = vperm.xlu0 %1688, %v485_v1   ;;  %663 = vperm.xlu1 %1689, %v469_v2   ;;  %v468_v24 = vld [vmem:[%s2154_s10 + $0x68] sm:$0xff]  ;;  %v467_v28 = vld [vmem:[%s2154_s10 + $0x60] sm:$0xff]  ;;  %v2223_v33 = vld [vmem:[%s2154_s10 + $0xb8] sm:$0xff]  ;;  %s1309_s6 = sld [smem:[#allocation3]] (!%p1535_p3) }
  0x62   : > { %v2226_v34 = vld [vmem:[%s2154_s10 + $0xb0] sm:$0xff]  ;;  %v2249_v42 = vld [vmem:[%s2154_s10 + $0x38] sm:$0xff]  ;;  %v2271_v48 = vld [vmem:[%s2154_s10 + $0xa8] sm:$0xff] }
  0x63   : > { %v2252_v43 = vld [vmem:[%s2154_s10 + $0x30] sm:$0xff]  ;;  %v2286_v53 = vld [vmem:[%s2154_s10 + $0xa0] sm:$0xff]  ;;  %v2301_v58 = vld [vmem:[%s2154_s10 + $0x28] sm:$0xff] }
  0x64   : > { %v2304_v59 = vld [vmem:[%s2154_s10 + $0x20] sm:$0xff]  ;;  %v2319_v63 = vld [vmem:[%s2154_s10 + $0x98] sm:$0xff] }
  0x65   : > { %v2184_v6 = vstv %s487_s5  ;;  %748 = vperm.xlu0 %1688, %v486_v4   ;;  %668 = vperm.xlu1 %1689, %v470_v5  }
  0x66   : > { %v2186_v7 = vstv %s521_s0  ;;  %v519_v8 = vmul.f32 %v2184_v6, %v485_v1  ;;  %v503_v9 = vmul.f32 %v2184_v6, %v469_v2  ;;  %v520_v10 = vmul.f32 %v2184_v6, %v486_v4 }
  0x67   : > { %v553_v11 = vmul.f32 %v2186_v7, %v485_v1  ;;  %v537_v12 = vmul.f32 %v2186_v7, %v469_v2  ;;  %v554_v13 = vmul.f32 %v2186_v7, %v486_v4  ;;  %v504_v14 = vmul.f32 %v2184_v6, %v470_v5  ;;  %v2334_v4 = vld [vmem:[%s2154_s10 + $0x90] sm:$0xff] }
  0x68   : > { %v538_v15 = vmul.f32 %v2186_v7, %v470_v5  ;;  %v2198_v21 = vmul.f32 %v2184_v6, %v484_v20  ;;  %v2201_v22 = vmul.f32 %v2186_v7, %v484_v20  ;;  %v517_v25 = vmul.f32 %v2184_v6, %v483_v23 }
  0x69   : > { %v585_v16 = vmax.f32 %v519_v8, %v553_v11  ;;  %v586_v17 = vmax.f32 %v520_v10, %v554_v13  ;;  %v569_v19 = vmax.f32 %v503_v9, %v537_v12  ;;  %v551_v26 = vmul.f32 %v2186_v7, %v483_v23  ;;  %v2351_v11 = vld [vmem:[%s2154_s10 + $0x18] sm:$0xff]  ;;  %v2354_v12 = vld [vmem:[%s2154_s10 + $0x10] sm:$0xff] }
  0x6a   : > { %v570_v18 = vmax.f32 %v504_v14, %v538_v15  ;;  %v2208_v27 = vmul.f32 %v2184_v6, %v468_v24  ;;  %v2212_v29 = vmul.f32 %v2186_v7, %v468_v24  ;;  %v2215_v30 = vmul.f32 %v2184_v6, %v467_v28  ;;  %v481_v13 = vld [vmem:[%s2154_s10 + $0xd0] sm:$0xff] }
  0x6b   : > { %941 = vperm.xlu0 %1688, %v585_v16   ;;  %946 = vperm.xlu1 %1689, %v586_v17   ;;  %v2218_v31 = vmul.f32 %v2186_v7, %v467_v28  ;;  %v584_v32 = vmax.f32 %v2198_v21, %v2201_v22  ;;  %v583_v35 = vmax.f32 %v517_v25, %v551_v26  ;;  %v2382_v21 = vld [vmem:[%s2154_s10 + $0x80] sm:$0xff]  ;;  %v2399_v26 = vld [vmem:[%s2154_s10 + $0x8] sm:$0xff]  ;;  %v465_v22 = vld [vmem:[%s2154_s10 + $0x50] sm:$0xff] }
  0x6c   : > { %v2230_v36 = vmul.f32 %v2184_v6, %v2223_v33  ;;  %v2234_v37 = vmul.f32 %v2186_v7, %v2223_v33  ;;  %v2238_v38 = vmul.f32 %v2184_v6, %v2226_v34  ;;  %v568_v39 = vmax.f32 %v2208_v27, %v2212_v29 }
  0x6d   : > { %v567_v40 = vmax.f32 %v2215_v30, %v2218_v31  ;;  %v2246_v41 = vmul.f32 %v2186_v7, %v2226_v34  ;;  %v2256_v44 = vmul.f32 %v2184_v6, %v2249_v42  ;;  %v2260_v45 = vmul.f32 %v2186_v7, %v2249_v42  ;;  %v2416_v31 = vld [vmem:[%s2154_s10] sm:$0xff] }
  0x6e   : > { %v2264_v46 = vmul.f32 %v2184_v6, %v2252_v43  ;;  %v2268_v47 = vmul.f32 %v2186_v7, %v2252_v43  ;;  %v2279_v51 = vmul.f32 %v2184_v6, %v2271_v48  ;;  %v2283_v52 = vmul.f32 %v2186_v7, %v2271_v48 }
  0x6f   : > { %866 = vperm.xlu1 %1689, %v570_v18   ;;  %861 = vperm.xlu0 %1688, %v569_v19   ;;  %v2294_v56 = vmul.f32 %v2184_v6, %v2286_v53  ;;  %v2298_v57 = vmul.f32 %v2186_v7, %v2286_v53  ;;  %v2308_v60 = vmul.f32 %v2184_v6, %v2301_v58  ;;  %v482_v18 = vld [vmem:[%s2154_s10 + $0xd8] sm:$0xff] }
  0x70   : > { %v2312_v61 = vmul.f32 %v2186_v7, %v2301_v58  ;;  %v2316_v62 = vmul.f32 %v2184_v6, %v2304_v59  ;;  %v2323_v0 = vmul.f32 %v2186_v7, %v2304_v59  ;;  %v2331_v3 = vmul.f32 %v2184_v6, %v2319_v63 }
  0x71   : > { %v2340_v8 = vmul.f32 %v2186_v7, %v2319_v63  ;;  %v2344_v9 = vmul.f32 %v2184_v6, %v2334_v4  ;;  %v2348_v10 = vmul.f32 %v2186_v7, %v2334_v4  ;;  %v2360_v14 = vmul.f32 %v2184_v6, %v2351_v11 }
  0x72   : > { %v2364_v15 = vmul.f32 %v2186_v7, %v2351_v11  ;;  %v2368_v16 = vmul.f32 %v2184_v6, %v2354_v12  ;;  %v2372_v17 = vmul.f32 %v2186_v7, %v2354_v12  ;;  %v2396_v25 = vmul.f32 %v2184_v6, %v2382_v21 }
  0x73   : > { %738 = vperm.xlu1 %1689, %v484_v20   ;;  %733 = vperm.xlu0 %1688, %v483_v23   ;;  %v2379_v20 = vld [vmem:[%s2154_s10 + $0x88] sm:$0xff]  ;;  %v2409_v29 = vmul.f32 %v2184_v6, %v2399_v26  ;;  %v2413_v30 = vmul.f32 %v2186_v7, %v2399_v26  ;;  %v516_v2 = vmul.f32 %v2184_v6, %v482_v18 }
  0x74   : > { %v2388_v23 = vmul.f32 %v2184_v6, %v2379_v20  ;;  %v550_v1 = vmul.f32 %v2186_v7, %v482_v18  ;;  %v515_v27 = vmul.f32 %v2184_v6, %v481_v13  ;;  %v499_v5 = vmul.f32 %v2184_v6, %v465_v22 }
  0x75   : > { %2704 = vst [vmem:[#allocation20_spill] sm:$0xff] %v2409_v29  ;;  %2705 = vst [vmem:[#allocation21_spill] sm:$0xff] %v2413_v30  ;;  %v533_v54 = vmul.f32 %v2186_v7, %v465_v22 }
  0x77   : > { %658 = vperm.xlu1 %1689, %v468_v24   ;;  %653 = vperm.xlu0 %1688, %v467_v28   ;;  %v2392_v24 = vmul.f32 %v2186_v7, %v2379_v20  ;;  %v2405_v28 = vmul.f32 %v2186_v7, %v2382_v21  ;;  %v565_v49 = vmax.f32 %v499_v5, %v533_v54 }
  0x7b   : > { %936 = vperm.xlu1 %1689, %v584_v32   ;;  %931 = vperm.xlu0 %1688, %v583_v35   ;;  %v2420_v32 = vmul.f32 %v2184_v6, %v2416_v31  ;;  %v2424_v35 = vmul.f32 %v2186_v7, %v2416_v31 }
  0x7d   : > { %2706 = vst [vmem:[#allocation22_spill] sm:$0xff] %v2420_v32  ;;  %2707 = vst [vmem:[#allocation23_spill] sm:$0xff] %v2424_v35  ;;  %v480_v35 = vld [vmem:[%s2154_s10 + $0xc8] sm:$0xff]  ;;  %v479_v32 = vld [vmem:[%s2154_s10 + $0xc0] sm:$0xff] }
  0x7e   : > { %v514_v30 = vmul.f32 %v2184_v6, %v480_v35  ;;  %v548_v29 = vmul.f32 %v2186_v7, %v480_v35 }
  0x7f   : > { %856 = vperm.xlu1 %1689, %v568_v39   ;;  %851 = vperm.xlu0 %1688, %v567_v40   ;;  %v549_v39 = vmul.f32 %v2186_v7, %v481_v13  ;;  %v466_v40 = vld [vmem:[%s2154_s10 + $0x58] sm:$0xff] }
  0x80   : > { %v500_v19 = vmul.f32 %v2184_v6, %v466_v40  ;;  %v534_v55 = vmul.f32 %v2186_v7, %v466_v40  ;;  %v580_v5 = vmax.f32 %v514_v30, %v548_v29  ;;  %v2710_v29 = vmax.f32 %v2256_v44, %v2260_v45 }
  0x81   : > { %v581_v50 = vmax.f32 %v515_v27, %v549_v39  ;;  %v2719_v44 = vmax.f32 %v2368_v16, %v2372_v17  ;;  %v2720_v45 = vmax.f32 %v2388_v23, %v2392_v24 }
  0x83   : > { %728 = vperm.xlu1 %1689, %v482_v18   ;;  %723 = vperm.xlu0 %1688, %v481_v13   ;;  %v582_v18 = vmax.f32 %v516_v2, %v550_v1  ;;  %v566_v13 = vmax.f32 %v500_v19, %v534_v55  ;;  %v547_v1 = vmul.f32 %v2186_v7, %v479_v32  ;;  %v464_v2 = vld [vmem:[%s2154_s10 + $0x48] sm:$0xff] }
  0x84   : > { %v532_v54 = vmul.f32 %v2186_v7, %v464_v2 }
  0x87   : > { %648 = vperm.xlu1 %1689, %v466_v40   ;;  %643 = vperm.xlu0 %1688, %v465_v22   ;;  %v513_v40 = vmul.f32 %v2184_v6, %v479_v32  ;;  %v463_v22 = vld [vmem:[%s2154_s10 + $0x40] sm:$0xff] }
  0x88   : > { %v531_v55 = vmul.f32 %v2186_v7, %v463_v22  ;;  %v2709_v7 = vmax.f32 %v2238_v38, %v2246_v41  ;;  %v2715_v38 = vmax.f32 %v2316_v62, %v2323_v0  ;;  %v2716_v41 = vmax.f32 %v2331_v3, %v2340_v8  ;;  %v2526_v62 = vld [vmem:[%s2163_s17 + $0x1] ss:$0 sm:$0xff] }
  0x89   : > { %v579_v19 = vmax.f32 %v513_v40, %v547_v1 }
  0x8b   : > { %926 = vperm.xlu1 %1689, %v582_v18   ;;  %921 = vperm.xlu0 %1688, %v581_v50   ;;  %v498_v50 = vmul.f32 %v2184_v6, %v464_v2 }
  0x8d   : > { %v564_v27 = vmax.f32 %v498_v50, %v532_v54 }
  0x8f   : > { %846 = vperm.xlu1 %1689, %v566_v13   ;;  %841 = vperm.xlu0 %1688, %v565_v49   ;;  %v497_v49 = vmul.f32 %v2184_v6, %v463_v22  ;;  %v2708_v6 = vmax.f32 %v2230_v36, %v2234_v37  ;;  %v2713_v36 = vmax.f32 %v2294_v56, %v2298_v57  ;;  %v2725_v56 = vld [vmem:[#allocation22_spill] sm:$0xff]  ;;  %v2726_v57 = vld [vmem:[#allocation23_spill] sm:$0xff] }
  0x90   : > { %v2714_v37 = vmax.f32 %v2308_v60, %v2312_v61  ;;  %v2523_v61 = vld [vmem:[%s2163_s17] ss:$0 sm:$0xff] }
  0x93   : > { %718 = vperm.xlu1 %1689, %v480_v35   ;;  %713 = vperm.xlu0 %1688, %v479_v32   ;;  %v563_v35 = vmax.f32 %v497_v49, %v531_v55  ;;  %v590_v49 = vld [vmem:[%s2168_s16] sm:$0x1f]  ;;  %v1106_v55 = vld [vmem:[%s2168_s16 + $0x8] sm:$0x1f] }
  0x97   : > { %638 = vperm.xlu1 %1689, %v464_v2   ;;  %633 = vperm.xlu0 %1688, %v463_v22  }
  0x9b   : > { %916 = vperm.xlu1 %1689, %v580_v5   ;;  %911 = vperm.xlu0 %1688, %v579_v19   ;;  %v2538_v5 = vpack.c.bf16 %v590_v49, %v590_v49  ;;  %v2540_v19 = vpack.c.bf16 %v1106_v55, %v1106_v55 }
  0x9d   : > { %1558 = vmatprep.mubr.bf16.mxu0 %v2538_v5  ;;  %1576 = vmatprep.mubr.bf16.mxu1 %v2540_v19 }
  0x9f   : > { %836 = vperm.xlu1 %1689, %v564_v27   ;;  %831 = vperm.xlu0 %1688, %v563_v35  }
  0xa3   : > { %708 = vperm.xlu1 %1689, %v2223_v33   ;;  %703 = vperm.xlu0 %1688, %v2226_v34   ;;  %v2711_v33 = vmax.f32 %v2264_v46, %v2268_v47  ;;  %v2712_v34 = vmax.f32 %v2279_v51, %v2283_v52  ;;  %v2721_v46 = vmax.f32 %v2396_v25, %v2405_v28  ;;  %v2722_v51 = vld [vmem:[#allocation20_spill] sm:$0xff]  ;;  %v2723_v52 = vld [vmem:[#allocation21_spill] sm:$0xff] }
  0xa7   : > { %628 = vperm.xlu1 %1689, %v2249_v42   ;;  %623 = vperm.xlu0 %1688, %v2252_v43   ;;  %v2717_v42 = vmax.f32 %v2344_v9, %v2348_v10  ;;  %v2718_v43 = vmax.f32 %v2360_v14, %v2364_v15 }
  0xab   : > { %906 = vperm.xlu1 %1689, %v2708_v6   ;;  %901 = vperm.xlu0 %1688, %v2709_v7  }
  0xaf   : > { %826 = vperm.xlu1 %1689, %v2710_v29   ;;  %821 = vperm.xlu0 %1688, %v2711_v33  }
  0xb3   : > { %698 = vperm.xlu1 %1689, %v2271_v48   ;;  %693 = vperm.xlu0 %1688, %v2286_v53   ;;  %v2724_v53 = vmax.f32 %v2722_v51, %v2723_v52 }
  0xb7   : > { %618 = vperm.xlu1 %1689, %v2301_v58   ;;  %613 = vperm.xlu0 %1688, %v2304_v59   ;;  %v2727_v58 = vmax.f32 %v2725_v56, %v2726_v57 }
  0xbb   : > { %896 = vperm.xlu1 %1689, %v2712_v34   ;;  %891 = vperm.xlu0 %1688, %v2713_v36  }
  0xbf   : > { %816 = vperm.xlu1 %1689, %v2714_v37   ;;  %811 = vperm.xlu0 %1688, %v2715_v38  }
  0xc3   : > { %688 = vperm.xlu1 %1689, %v2319_v63   ;;  %683 = vperm.xlu0 %1688, %v2334_v4  }
  0xc7   : > { %608 = vperm.xlu1 %1689, %v2351_v11   ;;  %603 = vperm.xlu0 %1688, %v2354_v12  }
  0xcb   : > { %886 = vperm.xlu1 %1689, %v2716_v41   ;;  %881 = vperm.xlu0 %1688, %v2717_v42  }
  0xcf   : > { %806 = vperm.xlu1 %1689, %v2718_v43   ;;  %801 = vperm.xlu0 %1688, %v2719_v44  }
  0xd3   : > { %678 = vperm.xlu1 %1689, %v2379_v20   ;;  %673 = vperm.xlu0 %1688, %v2382_v21  }
  0xd7   : > { %598 = vperm.xlu1 %1689, %v2399_v26   ;;  %593 = vperm.xlu0 %1688, %v2416_v31  }
  0xdb   : > { %876 = vperm.xlu1 %1689, %v2720_v45   ;;  %871 = vperm.xlu0 %1688, %v2721_v46  }
  0xdc   : > { %v744_v47 = vpop.permute.xlu0 %743  ;;  %v664_v48 = vpop.permute.xlu1 %663 }
  0xdd   : > { %v787_v63 = vmul.f32 %v2523_v61, %v744_v47  ;;  %v1143_v0 = vmul.f32 %v2526_v62, %v744_v47  ;;  %v771_v15 = vmul.f32 %v2523_v61, %v664_v48  ;;  %v1127_v24 = vmul.f32 %v2526_v62, %v664_v48 }
  0xdf   : > { %796 = vperm.xlu1 %1689, %v2724_v53   ;;  %791 = vperm.xlu0 %1688, %v2727_v58  }
  0xe0   : > { %v749_v59 = vpop.permute.xlu0 %748  ;;  %v669_v60 = vpop.permute.xlu1 %668 }
  0xe1   : > { %v788_v3 = vmul.f32 %v2523_v61, %v749_v59  ;;  %v1144_v4 = vmul.f32 %v2526_v62, %v749_v59  ;;  %v772_v16 = vmul.f32 %v2523_v61, %v669_v60  ;;  %v1128_v17 = vmul.f32 %v2526_v62, %v669_v60 }
  0xe6   : > { %v942_v8 = vpop.permute.xlu0 %941  ;;  %v947_v9 = vpop.permute.xlu1 %946 }
  0xe7   : > { %v979_v10 = vsub.f32 %v787_v63, %v942_v8  ;;  %v1175_v11 = vsub.f32 %v1143_v0, %v942_v8  ;;  %v980_v12 = vsub.f32 %v788_v3, %v947_v9  ;;  %v1176_v14 = vsub.f32 %v1144_v4, %v947_v9 }
  0xe9   : > { %v1041_v20 = vmul.f32 1.442695, %v979_v10  ;;  %v1237_v21 = vmul.f32 1.442695, %v1175_v11  ;;  %v1043_v23 = vmul.f32 1.442695, %v980_v12 }
  0xea   : > { %v1239_v25 = vmul.f32 1.442695, %v1176_v14  ;;  %v867_v26 = vpop.permute.xlu1 %866  ;;  %v862_v28 = vpop.permute.xlu0 %861 }
  0xeb   : > { %1690 = vpow2.f32 %v1041_v20  ;;  %v964_v30 = vsub.f32 %v772_v16, %v867_v26  ;;  %v1160_v31 = vsub.f32 %v1128_v17, %v867_v26  ;;  %v963_v32 = vsub.f32 %v771_v15, %v862_v28 }
  0xec   : > { %1692 = vpow2.f32 %v1237_v21  ;;  %v1159_v39 = vsub.f32 %v1127_v24, %v862_v28 }
  0xed   : > { %1694 = vpow2.f32 %v1043_v23  ;;  %v1011_v18 = vmul.f32 1.442695, %v964_v30  ;;  %v1207_v13 = vmul.f32 1.442695, %v1160_v31  ;;  %v1009_v40 = vmul.f32 1.442695, %v963_v32 }
  0xee   : > { %1696 = vpow2.f32 %v1239_v25  ;;  %v1205_v1 = vmul.f32 1.442695, %v1159_v39  ;;  %v739_v2 = vpop.permute.xlu1 %738  ;;  %v734_v22 = vpop.permute.xlu0 %733 }
  0xef   : > { %1698 = vpow2.f32 %v1011_v18  ;;  %v786_v27 = vmul.f32 %v2523_v61, %v739_v2  ;;  %v1142_v35 = vmul.f32 %v2526_v62, %v739_v2  ;;  %v785_v6 = vmul.f32 %v2523_v61, %v734_v22 }
  0xf0   : > { %1700 = vpow2.f32 %v1207_v13  ;;  %v1141_v7 = vmul.f32 %v2526_v62, %v734_v22 }
  0xf1   : > { %1702 = vpow2.f32 %v1009_v40 }
  0xf2   : > { %1704 = vpow2.f32 %v1205_v1  ;;  %v659_v50 = vpop.permute.xlu1 %658  ;;  %v654_v54 = vpop.permute.xlu0 %653 }
  0xf3   : > { %v770_v42 = vmul.f32 %v2523_v61, %v659_v50  ;;  %v1126_v43 = vmul.f32 %v2526_v62, %v659_v50  ;;  %v769_v45 = vmul.f32 %v2523_v61, %v654_v54  ;;  %v1125_v52 = vmul.f32 %v2526_v62, %v654_v54 }
  0xf6   : > { %v937_v29 = vpop.permute.xlu1 %936  ;;  %v932_v33 = vpop.permute.xlu0 %931 }
  0xf7   : > { %v978_v34 = vsub.f32 %v786_v27, %v937_v29  ;;  %v1174_v36 = vsub.f32 %v1142_v35, %v937_v29  ;;  %v977_v37 = vsub.f32 %v785_v6, %v932_v33  ;;  %v1173_v38 = vsub.f32 %v1141_v7, %v932_v33 }
  0xf8   : > { %v1691_v41 = vpop.eup %1690 }
  0xf9   : > { %v1693_v44 = vpop.eup %1692  ;;  %v1039_v46 = vmul.f32 1.442695, %v978_v34  ;;  %v1235_v47 = vmul.f32 1.442695, %v1174_v36  ;;  %v1037_v48 = vmul.f32 1.442695, %v977_v37 }
  0xfa   : > { %v1695_v51 = vpop.eup %1694  ;;  %v1233_v53 = vmul.f32 1.442695, %v1173_v38  ;;  %v857_v56 = vpop.permute.xlu1 %856 }
  0xfb   : > { %v852_v57 = vpop.permute.xlu0 %851  ;;  %v1697_v58 = vpop.eup %1696  ;;  %1706 = vpow2.f32 %v1039_v46  ;;  %v962_v59 = vsub.f32 %v770_v42, %v857_v56  ;;  %v1158_v60 = vsub.f32 %v1126_v43, %v857_v56  ;;  %v1061_v4 = vpack.c.bf16 %v1695_v51, %v1691_v41 }
  0xfc   : > { %v961_v63 = vsub.f32 %v769_v45, %v852_v57  ;;  %v1699_v0 = vpop.eup %1698  ;;  %1708 = vpow2.f32 %v1235_v47  ;;  %v1157_v3 = vsub.f32 %v1125_v52, %v852_v57  ;;  %v1257_v8 = vpack.c.bf16 %v1697_v58, %v1693_v44 }
  0xfd   : > { %v1701_v9 = vpop.eup %1700  ;;  %1710 = vpow2.f32 %v1037_v48  ;;  %v1007_v10 = vmul.f32 1.442695, %v962_v59  ;;  %v1203_v11 = vmul.f32 1.442695, %v1158_v60  ;;  %1542 = vmatprep.subr.bf16.mxu0 %v1061_v4 }
  0xfe   : > { %v1005_v12 = vmul.f32 1.442695, %v961_v63  ;;  %v1703_v14 = vpop.eup %1702  ;;  %1712 = vpow2.f32 %v1233_v53  ;;  %v1201_v15 = vmul.f32 1.442695, %v1157_v3  ;;  %1560 = vmatprep.subr.bf16.mxu1 %v1257_v8  ;;  %v729_v16 = vpop.permute.xlu1 %728 }
  0xff   : > { %v724_v17 = vpop.permute.xlu0 %723  ;;  %v1705_v20 = vpop.eup %1704  ;;  %1714 = vpow2.f32 %v1007_v10  ;;  %v1053_v21 = vpack.c.bf16 %v1699_v0, %v1703_v14  ;;  %v784_v26 = vmul.f32 %v2523_v61, %v729_v16  ;;  %v1140_v28 = vmul.f32 %v2526_v62, %v729_v16 }
 0x100   : > { %1716 = vpow2.f32 %v1203_v11  ;;  %v1249_v23 = vpack.c.bf16 %v1701_v9, %v1705_v20  ;;  %v783_v30 = vmul.f32 %v2523_v61, %v724_v17  ;;  %v1139_v31 = vmul.f32 %v2526_v62, %v724_v17 }
 0x101   : > { %1718 = vpow2.f32 %v1005_v12  ;;  %1543 = vmatpush3.bf16.xpose.msra.mxu0 %v1053_v21 }
 0x102   : > { %1720 = vpow2.f32 %v1201_v15  ;;  %1561 = vmatpush3.bf16.xpose.msra.mxu1 %v1249_v23  ;;  %v649_v24 = vpop.permute.xlu1 %648 }
 0x103   : > { %v644_v25 = vpop.permute.xlu0 %643  ;;  %v768_v22 = vmul.f32 %v2523_v61, %v649_v24  ;;  %v1124_v50 = vmul.f32 %v2526_v62, %v649_v24 }
 0x104   : > { %v767_v49 = vmul.f32 %v2523_v61, %v644_v25  ;;  %v1123_v7 = vmul.f32 %v2526_v62, %v644_v25 }
 0x106   : > { %v927_v32 = vpop.permute.xlu1 %926 }
 0x107   : > { %v922_v39 = vpop.permute.xlu0 %921  ;;  %v976_v18 = vsub.f32 %v784_v26, %v927_v32  ;;  %v1172_v13 = vsub.f32 %v1140_v28, %v927_v32 }
 0x108   : > { %v975_v40 = vsub.f32 %v783_v30, %v922_v39  ;;  %v1171_v1 = vsub.f32 %v1139_v31, %v922_v39  ;;  %v1707_v2 = vpop.eup %1706 }
 0x109   : > { %v1709_v54 = vpop.eup %1708  ;;  %v1035_v55 = vmul.f32 1.442695, %v976_v18  ;;  %v1231_v27 = vmul.f32 1.442695, %v1172_v13 }
 0x10a   : > { %v1033_v35 = vmul.f32 1.442695, %v975_v40  ;;  %v1711_v6 = vpop.eup %1710  ;;  %v1229_v29 = vmul.f32 1.442695, %v1171_v1  ;;  %v847_v33 = vpop.permute.xlu1 %846 }
 0x10b   : > { %v842_v34 = vpop.permute.xlu0 %841  ;;  %v1713_v36 = vpop.eup %1712  ;;  %1722 = vpow2.f32 %v1035_v55  ;;  %v960_v37 = vsub.f32 %v768_v22, %v847_v33  ;;  %v1156_v38 = vsub.f32 %v1124_v50, %v847_v33  ;;  %v1060_v44 = vpack.c.bf16 %v1707_v2, %v1711_v6 }
 0x10c   : > { %v959_v41 = vsub.f32 %v767_v49, %v842_v34  ;;  %v1715_v42 = vpop.eup %1714  ;;  %1724 = vpow2.f32 %v1231_v27  ;;  %v1155_v43 = vsub.f32 %v1123_v7, %v842_v34  ;;  %v1256_v45 = vpack.c.bf16 %v1709_v54, %v1713_v36 }
 0x10d   : > { %v1717_v46 = vpop.eup %1716  ;;  %1726 = vpow2.f32 %v1033_v35  ;;  %v1003_v47 = vmul.f32 1.442695, %v960_v37  ;;  %v1199_v48 = vmul.f32 1.442695, %v1156_v38  ;;  %1544 = vmatprep.subr.bf16.mxu0 %v1060_v44 }
 0x10e   : > { %v1001_v51 = vmul.f32 1.442695, %v959_v41  ;;  %v1719_v52 = vpop.eup %1718  ;;  %1728 = vpow2.f32 %v1229_v29  ;;  %v1197_v53 = vmul.f32 1.442695, %v1155_v43  ;;  %1562 = vmatprep.subr.bf16.mxu1 %v1256_v45  ;;  %v719_v56 = vpop.permute.xlu1 %718 }
 0x10f   : > { %v714_v57 = vpop.permute.xlu0 %713  ;;  %v1721_v58 = vpop.eup %1720  ;;  %1730 = vpow2.f32 %v1003_v47  ;;  %v1052_v59 = vpack.c.bf16 %v1715_v42, %v1719_v52  ;;  %v782_v3 = vmul.f32 %v2523_v61, %v719_v56  ;;  %v1138_v4 = vmul.f32 %v2526_v62, %v719_v56 }
 0x110   : > { %1732 = vpow2.f32 %v1199_v48  ;;  %v1248_v60 = vpack.c.bf16 %v1717_v46, %v1721_v58  ;;  %v781_v8 = vmul.f32 %v2523_v61, %v714_v57  ;;  %v1137_v9 = vmul.f32 %v2526_v62, %v714_v57 }
 0x111   : > { %1734 = vpow2.f32 %v1001_v51  ;;  %1545 = vmatpush3.bf16.xpose.msra.mxu0 %v1052_v59 }
 0x112   : > { %1736 = vpow2.f32 %v1197_v53  ;;  %1563 = vmatpush3.bf16.xpose.msra.mxu1 %v1248_v60  ;;  %v639_v63 = vpop.permute.xlu1 %638 }
 0x113   : > { %v634_v0 = vpop.permute.xlu0 %633  ;;  %v766_v20 = vmul.f32 %v2523_v61, %v639_v63  ;;  %v1122_v21 = vmul.f32 %v2526_v62, %v639_v63 }
 0x114   : > { %v765_v24 = vmul.f32 %v2523_v61, %v634_v0  ;;  %v1121_v31 = vmul.f32 %v2526_v62, %v634_v0 }
 0x116   : > { %v917_v10 = vpop.permute.xlu1 %916 }
 0x117   : > { %v912_v11 = vpop.permute.xlu0 %911  ;;  %v974_v12 = vsub.f32 %v782_v3, %v917_v10  ;;  %v1170_v14 = vsub.f32 %v1138_v4, %v917_v10 }
 0x118   : > { %v973_v15 = vsub.f32 %v781_v8, %v912_v11  ;;  %v1169_v16 = vsub.f32 %v1137_v9, %v912_v11  ;;  %v1723_v17 = vpop.eup %1722 }
 0x119   : > { %v1725_v23 = vpop.eup %1724  ;;  %v1031_v25 = vmul.f32 1.442695, %v974_v12  ;;  %v1227_v26 = vmul.f32 1.442695, %v1170_v14 }
 0x11a   : > { %v1029_v28 = vmul.f32 1.442695, %v973_v15  ;;  %v1727_v30 = vpop.eup %1726  ;;  %v1225_v32 = vmul.f32 1.442695, %v1169_v16  ;;  %v837_v39 = vpop.permute.xlu1 %836 }
 0x11b   : > { %v832_v18 = vpop.permute.xlu0 %831  ;;  %v1729_v13 = vpop.eup %1728  ;;  %1738 = vpow2.f32 %v1031_v25  ;;  %v958_v40 = vsub.f32 %v766_v20, %v837_v39  ;;  %v1154_v1 = vsub.f32 %v1122_v21, %v837_v39  ;;  %v1059_v54 = vpack.c.bf16 %v1723_v17, %v1727_v30 }
 0x11c   : > { %v957_v2 = vsub.f32 %v765_v24, %v832_v18  ;;  %v1731_v22 = vpop.eup %1730  ;;  %1740 = vpow2.f32 %v1227_v26  ;;  %v1153_v50 = vsub.f32 %v1121_v31, %v832_v18  ;;  %v1255_v49 = vpack.c.bf16 %v1725_v23, %v1729_v13 }
 0x11d   : > { %v1733_v55 = vpop.eup %1732  ;;  %1742 = vpow2.f32 %v1029_v28  ;;  %v999_v27 = vmul.f32 1.442695, %v958_v40  ;;  %v1195_v35 = vmul.f32 1.442695, %v1154_v1  ;;  %1546 = vmatprep.subr.bf16.mxu0 %v1059_v54 }
 0x11e   : > { %v997_v6 = vmul.f32 1.442695, %v957_v2  ;;  %v1735_v7 = vpop.eup %1734  ;;  %1744 = vpow2.f32 %v1225_v32  ;;  %v1193_v29 = vmul.f32 1.442695, %v1153_v50  ;;  %1564 = vmatprep.subr.bf16.mxu1 %v1255_v49  ;;  %v709_v33 = vpop.permute.xlu1 %708 }
 0x11f   : > { %v704_v34 = vpop.permute.xlu0 %703  ;;  %v1737_v36 = vpop.eup %1736  ;;  %1746 = vpow2.f32 %v999_v27  ;;  %v1051_v37 = vpack.c.bf16 %v1731_v22, %v1735_v7  ;;  %v780_v43 = vmul.f32 %v2523_v61, %v709_v33  ;;  %v1136_v44 = vmul.f32 %v2526_v62, %v709_v33 }
 0x120   : > { %1748 = vpow2.f32 %v1195_v35  ;;  %v1247_v38 = vpack.c.bf16 %v1733_v55, %v1737_v36  ;;  %v779_v45 = vmul.f32 %v2523_v61, %v704_v34  ;;  %v1135_v46 = vmul.f32 %v2526_v62, %v704_v34 }
 0x121   : > { %1750 = vpow2.f32 %v997_v6  ;;  %1547 = vmatpush3.bf16.xpose.msra.mxu0 %v1051_v37 }
 0x122   : > { %1752 = vpow2.f32 %v1193_v29  ;;  %1565 = vmatpush3.bf16.xpose.msra.mxu1 %v1247_v38  ;;  %v629_v41 = vpop.permute.xlu1 %628 }
 0x123   : > { %v624_v42 = vpop.permute.xlu0 %623  ;;  %v764_v58 = vmul.f32 %v2523_v61, %v629_v41  ;;  %v1120_v59 = vmul.f32 %v2526_v62, %v629_v41 }
 0x124   : > { %v763_v63 = vmul.f32 %v2523_v61, %v624_v42  ;;  %v1119_v9 = vmul.f32 %v2526_v62, %v624_v42 }
 0x126   : > { %v907_v47 = vpop.permute.xlu1 %906 }
 0x127   : > { %v902_v48 = vpop.permute.xlu0 %901  ;;  %v972_v51 = vsub.f32 %v780_v43, %v907_v47  ;;  %v1168_v52 = vsub.f32 %v1136_v44, %v907_v47 }
 0x128   : > { %v971_v53 = vsub.f32 %v779_v45, %v902_v48  ;;  %v1167_v56 = vsub.f32 %v1135_v46, %v902_v48  ;;  %v1739_v57 = vpop.eup %1738 }
 0x129   : > { %v1741_v60 = vpop.eup %1740  ;;  %v1027_v0 = vmul.f32 1.442695, %v972_v51  ;;  %v1223_v3 = vmul.f32 1.442695, %v1168_v52 }
 0x12a   : > { %v1025_v4 = vmul.f32 1.442695, %v971_v53  ;;  %v1743_v8 = vpop.eup %1742  ;;  %v1221_v10 = vmul.f32 1.442695, %v1167_v56  ;;  %v827_v11 = vpop.permute.xlu1 %826 }
 0x12b   : > { %v822_v12 = vpop.permute.xlu0 %821  ;;  %v1745_v14 = vpop.eup %1744  ;;  %1754 = vpow2.f32 %v1027_v0  ;;  %v956_v15 = vsub.f32 %v764_v58, %v827_v11  ;;  %v1152_v16 = vsub.f32 %v1120_v59, %v827_v11  ;;  %v1058_v23 = vpack.c.bf16 %v1739_v57, %v1743_v8 }
 0x12c   : > { %v955_v17 = vsub.f32 %v763_v63, %v822_v12  ;;  %v1747_v20 = vpop.eup %1746  ;;  %1756 = vpow2.f32 %v1223_v3  ;;  %v1151_v21 = vsub.f32 %v1119_v9, %v822_v12  ;;  %v1254_v24 = vpack.c.bf16 %v1741_v60, %v1745_v14 }
 0x12d   : > { %v1749_v25 = vpop.eup %1748  ;;  %1758 = vpow2.f32 %v1025_v4  ;;  %v995_v26 = vmul.f32 1.442695, %v956_v15  ;;  %v1191_v28 = vmul.f32 1.442695, %v1152_v16  ;;  %1548 = vmatprep.subr.bf16.mxu0 %v1058_v23 }
 0x12e   : > { %v993_v30 = vmul.f32 1.442695, %v955_v17  ;;  %v1751_v31 = vpop.eup %1750  ;;  %1760 = vpow2.f32 %v1221_v10  ;;  %v1189_v32 = vmul.f32 1.442695, %v1151_v21  ;;  %1566 = vmatprep.subr.bf16.mxu1 %v1254_v24  ;;  %v699_v39 = vpop.permute.xlu1 %698 }
 0x12f   : > { %v694_v18 = vpop.permute.xlu0 %693  ;;  %v1753_v13 = vpop.eup %1752  ;;  %1762 = vpow2.f32 %v995_v26  ;;  %v1050_v40 = vpack.c.bf16 %v1747_v20, %v1751_v31  ;;  %v778_v50 = vmul.f32 %v2523_v61, %v699_v39  ;;  %v1134_v54 = vmul.f32 %v2526_v62, %v699_v39 }
 0x130   : > { %1764 = vpow2.f32 %v1191_v28  ;;  %v1246_v1 = vpack.c.bf16 %v1749_v25, %v1753_v13  ;;  %v777_v49 = vmul.f32 %v2523_v61, %v694_v18  ;;  %v1133_v55 = vmul.f32 %v2526_v62, %v694_v18 }
 0x131   : > { %1766 = vpow2.f32 %v993_v30  ;;  %1549 = vmatpush3.bf16.xpose.msra.mxu0 %v1050_v40 }
 0x132   : > { %1768 = vpow2.f32 %v1189_v32  ;;  %1567 = vmatpush3.bf16.xpose.msra.mxu1 %v1246_v1  ;;  %v619_v2 = vpop.permute.xlu1 %618 }
 0x133   : > { %v614_v22 = vpop.permute.xlu0 %613  ;;  %v762_v36 = vmul.f32 %v2523_v61, %v619_v2  ;;  %v1118_v37 = vmul.f32 %v2526_v62, %v619_v2 }
 0x134   : > { %v761_v41 = vmul.f32 %v2523_v61, %v614_v22  ;;  %v1117_v46 = vmul.f32 %v2526_v62, %v614_v22 }
 0x136   : > { %v897_v27 = vpop.permute.xlu1 %896 }
 0x137   : > { %v892_v35 = vpop.permute.xlu0 %891  ;;  %v970_v6 = vsub.f32 %v778_v50, %v897_v27  ;;  %v1166_v7 = vsub.f32 %v1134_v54, %v897_v27 }
 0x138   : > { %v969_v29 = vsub.f32 %v777_v49, %v892_v35  ;;  %v1165_v33 = vsub.f32 %v1133_v55, %v892_v35  ;;  %v1755_v34 = vpop.eup %1754 }
 0x139   : > { %v1757_v38 = vpop.eup %1756  ;;  %v1023_v42 = vmul.f32 1.442695, %v970_v6  ;;  %v1219_v43 = vmul.f32 1.442695, %v1166_v7 }
 0x13a   : > { %v1021_v44 = vmul.f32 1.442695, %v969_v29  ;;  %v1759_v45 = vpop.eup %1758  ;;  %v1217_v47 = vmul.f32 1.442695, %v1165_v33  ;;  %v817_v48 = vpop.permute.xlu1 %816 }
 0x13b   : > { %v812_v51 = vpop.permute.xlu0 %811  ;;  %v1761_v52 = vpop.eup %1760  ;;  %1770 = vpow2.f32 %v1023_v42  ;;  %v954_v53 = vsub.f32 %v762_v36, %v817_v48  ;;  %v1150_v56 = vsub.f32 %v1118_v37, %v817_v48  ;;  %v1057_v60 = vpack.c.bf16 %v1755_v34, %v1759_v45 }
 0x13c   : > { %v953_v57 = vsub.f32 %v761_v41, %v812_v51  ;;  %v1763_v58 = vpop.eup %1762  ;;  %1772 = vpow2.f32 %v1219_v43  ;;  %v1149_v59 = vsub.f32 %v1117_v46, %v812_v51  ;;  %v1253_v63 = vpack.c.bf16 %v1757_v38, %v1761_v52 }
 0x13d   : > { %v1765_v0 = vpop.eup %1764  ;;  %1774 = vpow2.f32 %v1021_v44  ;;  %v991_v3 = vmul.f32 1.442695, %v954_v53  ;;  %v1187_v4 = vmul.f32 1.442695, %v1150_v56  ;;  %1550 = vmatprep.subr.bf16.mxu0 %v1057_v60 }
 0x13e   : > { %v989_v8 = vmul.f32 1.442695, %v953_v57  ;;  %v1767_v9 = vpop.eup %1766  ;;  %1776 = vpow2.f32 %v1217_v47  ;;  %v1185_v10 = vmul.f32 1.442695, %v1149_v59  ;;  %1568 = vmatprep.subr.bf16.mxu1 %v1253_v63  ;;  %v689_v11 = vpop.permute.xlu1 %688 }
 0x13f   : > { %v684_v12 = vpop.permute.xlu0 %683  ;;  %v1769_v14 = vpop.eup %1768  ;;  %1778 = vpow2.f32 %v991_v3  ;;  %v1049_v15 = vpack.c.bf16 %v1763_v58, %v1767_v9  ;;  %v776_v21 = vmul.f32 %v2523_v61, %v689_v11  ;;  %v1132_v23 = vmul.f32 %v2526_v62, %v689_v11 }
 0x140   : > { %1780 = vpow2.f32 %v1187_v4  ;;  %v1245_v16 = vpack.c.bf16 %v1765_v0, %v1769_v14  ;;  %v775_v24 = vmul.f32 %v2523_v61, %v684_v12  ;;  %v1131_v25 = vmul.f32 %v2526_v62, %v684_v12 }
 0x141   : > { %1782 = vpow2.f32 %v989_v8  ;;  %1551 = vmatpush3.bf16.xpose.msra.mxu0 %v1049_v15 }
 0x142   : > { %1784 = vpow2.f32 %v1185_v10  ;;  %1569 = vmatpush3.bf16.xpose.msra.mxu1 %v1245_v16  ;;  %v609_v17 = vpop.permute.xlu1 %608 }
 0x143   : > { %v604_v20 = vpop.permute.xlu0 %603  ;;  %v760_v13 = vmul.f32 %v2523_v61, %v609_v17  ;;  %v1116_v40 = vmul.f32 %v2526_v62, %v609_v17 }
 0x144   : > { %v759_v2 = vmul.f32 %v2523_v61, %v604_v20  ;;  %v1115_v55 = vmul.f32 %v2526_v62, %v604_v20 }
 0x146   : > { %v887_v26 = vpop.permute.xlu1 %886 }
 0x147   : > { %v882_v28 = vpop.permute.xlu0 %881  ;;  %v968_v30 = vsub.f32 %v776_v21, %v887_v26  ;;  %v1164_v31 = vsub.f32 %v1132_v23, %v887_v26 }
 0x148   : > { %v967_v32 = vsub.f32 %v775_v24, %v882_v28  ;;  %v1163_v39 = vsub.f32 %v1131_v25, %v882_v28  ;;  %v1771_v18 = vpop.eup %1770 }
 0x149   : > { %v1773_v1 = vpop.eup %1772  ;;  %v1019_v22 = vmul.f32 1.442695, %v968_v30  ;;  %v1215_v50 = vmul.f32 1.442695, %v1164_v31 }
 0x14a   : > { %v1017_v54 = vmul.f32 1.442695, %v967_v32  ;;  %v1775_v49 = vpop.eup %1774  ;;  %v1213_v27 = vmul.f32 1.442695, %v1163_v39  ;;  %v807_v35 = vpop.permute.xlu1 %806 }
 0x14b   : > { %v802_v6 = vpop.permute.xlu0 %801  ;;  %v1777_v7 = vpop.eup %1776  ;;  %1786 = vpow2.f32 %v1019_v22  ;;  %v952_v29 = vsub.f32 %v760_v13, %v807_v35  ;;  %v1148_v33 = vsub.f32 %v1116_v40, %v807_v35  ;;  %v1056_v38 = vpack.c.bf16 %v1771_v18, %v1775_v49 }
 0x14c   : > { %v951_v34 = vsub.f32 %v759_v2, %v802_v6  ;;  %v1779_v36 = vpop.eup %1778  ;;  %1788 = vpow2.f32 %v1215_v50  ;;  %v1147_v37 = vsub.f32 %v1115_v55, %v802_v6  ;;  %v1252_v41 = vpack.c.bf16 %v1773_v1, %v1777_v7 }
 0x14d   : > { %v1781_v42 = vpop.eup %1780  ;;  %1790 = vpow2.f32 %v1017_v54  ;;  %v987_v43 = vmul.f32 1.442695, %v952_v29  ;;  %v1183_v44 = vmul.f32 1.442695, %v1148_v33  ;;  %1552 = vmatprep.subr.bf16.mxu0 %v1056_v38 }
 0x14e   : > { %v985_v45 = vmul.f32 1.442695, %v951_v34  ;;  %v1783_v46 = vpop.eup %1782  ;;  %1792 = vpow2.f32 %v1213_v27  ;;  %v1181_v47 = vmul.f32 1.442695, %v1147_v37  ;;  %1570 = vmatprep.subr.bf16.mxu1 %v1252_v41  ;;  %v679_v48 = vpop.permute.xlu1 %678 }
 0x14f   : > { %v674_v51 = vpop.permute.xlu0 %673  ;;  %v1785_v52 = vpop.eup %1784  ;;  %1794 = vpow2.f32 %v987_v43  ;;  %v1048_v53 = vpack.c.bf16 %v1779_v36, %v1783_v46  ;;  %v774_v59 = vmul.f32 %v2523_v61, %v679_v48  ;;  %v1130_v60 = vmul.f32 %v2526_v62, %v679_v48 }
 0x150   : > { %1796 = vpow2.f32 %v1183_v44  ;;  %v1244_v56 = vpack.c.bf16 %v1781_v42, %v1785_v52  ;;  %v773_v63 = vmul.f32 %v2523_v61, %v674_v51  ;;  %v1129_v0 = vmul.f32 %v2526_v62, %v674_v51 }
 0x151   : > { %1798 = vpow2.f32 %v985_v45  ;;  %1553 = vmatpush3.bf16.xpose.msra.mxu0 %v1048_v53  ;;  %v587_v45 = vld [vmem:[#allocation2] sm:$0x1f] }
 0x152   : > { %1800 = vpow2.f32 %v1181_v47  ;;  %1571 = vmatpush3.bf16.xpose.msra.mxu1 %v1244_v56  ;;  %v599_v57 = vpop.permute.xlu1 %598  ;;  %v588_v47 = vld [vmem:[#allocation2 + $0x8] sm:$0x1f] }
 0x153   : > { %v594_v58 = vpop.permute.xlu0 %593  ;;  %v758_v14 = vmul.f32 %v2523_v61, %v599_v57  ;;  %v1114_v15 = vmul.f32 %v2526_v62, %v599_v57 }
 0x154   : > { %v757_v17 = vmul.f32 %v2523_v61, %v594_v58  ;;  %v1113_v25 = vmul.f32 %v2526_v62, %v594_v58 }
 0x156   : > { %v877_v3 = vpop.permute.xlu1 %876 }
 0x157   : > { %v872_v4 = vpop.permute.xlu0 %871  ;;  %v966_v8 = vsub.f32 %v774_v59, %v877_v3  ;;  %v1162_v9 = vsub.f32 %v1130_v60, %v877_v3 }
 0x158   : > { %v965_v10 = vsub.f32 %v773_v63, %v872_v4  ;;  %v1161_v11 = vsub.f32 %v1129_v0, %v872_v4  ;;  %v1787_v12 = vpop.eup %1786 }
 0x159   : > { %v1789_v16 = vpop.eup %1788  ;;  %v1015_v20 = vmul.f32 1.442695, %v966_v8  ;;  %v1211_v21 = vmul.f32 1.442695, %v1162_v9 }
 0x15a   : > { %v1013_v23 = vmul.f32 1.442695, %v965_v10  ;;  %v1791_v24 = vpop.eup %1790  ;;  %v1209_v26 = vmul.f32 1.442695, %v1161_v11  ;;  %v797_v28 = vpop.permute.xlu1 %796 }
 0x15b   : > { %v792_v30 = vpop.permute.xlu0 %791  ;;  %v1793_v31 = vpop.eup %1792  ;;  %1802 = vpow2.f32 %v1015_v20  ;;  %v950_v32 = vsub.f32 %v758_v14, %v797_v28  ;;  %v1146_v39 = vsub.f32 %v1114_v15, %v797_v28  ;;  %v1055_v1 = vpack.c.bf16 %v1787_v12, %v1791_v24 }
 0x15c   : > { %v949_v18 = vsub.f32 %v757_v17, %v792_v30  ;;  %v1795_v13 = vpop.eup %1794  ;;  %1804 = vpow2.f32 %v1211_v21  ;;  %v1145_v40 = vsub.f32 %v1113_v25, %v792_v30  ;;  %v1251_v2 = vpack.c.bf16 %v1789_v16, %v1793_v31 }
 0x15d   : > { %v1797_v61 = vpop.eup %1796  ;;  %1806 = vpow2.f32 %v1013_v23  ;;  %v983_v22 = vmul.f32 1.442695, %v950_v32  ;;  %v1179_v50 = vmul.f32 1.442695, %v1146_v39  ;;  %1554 = vmatprep.subr.bf16.mxu0 %v1055_v1 }
 0x15e   : > { %v981_v54 = vmul.f32 1.442695, %v949_v18  ;;  %v1799_v49 = vpop.eup %1798  ;;  %1808 = vpow2.f32 %v1209_v26  ;;  %v1177_v62 = vmul.f32 1.442695, %v1145_v40  ;;  %1572 = vmatprep.subr.bf16.mxu1 %v1251_v2 }
 0x15f   : > { %v1801_v55 = vpop.eup %1800  ;;  %1810 = vpow2.f32 %v983_v22  ;;  %v1047_v27 = vpack.c.bf16 %v1795_v13, %v1799_v49 }
 0x160   : > { %1812 = vpow2.f32 %v1179_v50  ;;  %v1243_v35 = vpack.c.bf16 %v1797_v61, %v1801_v55 }
 0x161   : > { %1814 = vpow2.f32 %v981_v54  ;;  %1555 = vmatpush3.bf16.xpose.msra.mxu0 %v1047_v27 }
 0x162   : > { %1816 = vpow2.f32 %v1177_v62  ;;  %1573 = vmatpush3.bf16.xpose.msra.mxu1 %v1243_v35 }
 0x168   : > { %v1803_v6 = vpop.eup %1802 }
 0x169   : > { %v1805_v7 = vpop.eup %1804 }
 0x16a   : > { %v1807_v29 = vpop.eup %1806 }
 0x16b   : > { %v1809_v33 = vpop.eup %1808  ;;  %v1054_v34 = vpack.c.bf16 %v1803_v6, %v1807_v29 }
 0x16c   : > { %v1811_v36 = vpop.eup %1810  ;;  %v1250_v37 = vpack.c.bf16 %v1805_v7, %v1809_v33 }
 0x16d   : > { %v1813_v38 = vpop.eup %1812  ;;  %1556 = vmatprep.subr.bf16.mxu0 %v1054_v34 }
 0x16e   : > { %v1815_v41 = vpop.eup %1814  ;;  %1574 = vmatprep.subr.bf16.mxu1 %v1250_v37 }
 0x16f   : > { %v1817_v42 = vpop.eup %1816  ;;  %v1046_v43 = vpack.c.bf16 %v1811_v36, %v1815_v41 }
 0x170   : > { %v1242_v44 = vpack.c.bf16 %v1813_v38, %v1817_v42 }
 0x171   : > { %1557 = vmatpush3.bf16.xpose.msra.mxu0 %v1046_v43 }
 0x172   : > { %1575 = vmatpush3.bf16.xpose.msra.mxu1 %v1242_v44 }
 0x178   : > { %1559 = vmatmul.mubr.bf16.vlgmr.msra.gmra.mxu0 %v2538_v5 }
 0x179   : > { %1577 = vmatmul.mubr.bf16.vlgmr.msra.gmra.mxu1 %v2540_v19 }
 0x238   : > { %v1096_v46 = vpop.f32.mrf.mxu0 }
 0x239   : > { %v1103_v48 = vadd.f32 %v1096_v46, %v587_v45  ;;  %v1292_v51 = vpop.f32.mrf.mxu1 }
 0x23a   : > { %v1098_v52 = vpop.f32.mrf.mxu0 }
 0x23b   : > { %v1299_v53 = vadd.f32 %v1292_v51, %v1103_v48  ;;  %v1104_v56 = vadd.f32 %v1098_v52, %v588_v47  ;;  %v1294_v57 = vpop.f32.mrf.mxu1  ;;  %1306 = sbr.rel (%p1535_p3) target bundleno = 608 (0x260), region = 64 }
 0x23c   : > { %v1100_v58 = vpop.f32.mrf.mxu0 }
 0x23d   : > { %1301 = vst [vmem:[#allocation2] sm:$0x1f] %v1299_v53  ;;  %v1300_v59 = vadd.f32 %v1294_v57, %v1104_v56  ;;  %v1296_v60 = vpop.f32.mrf.mxu1 }
 0x23e   : > { %v1101_v63 = vpop.f32.mrf.mxu0 }
 0x23f   : > { %1302 = vst [vmem:[#allocation2 + $0x8] sm:$0x1f] %v1300_v59  ;;  %v1297_v0 = vpop.f32.mrf.mxu1 }
 0x240   : > { %v1315_v3 = vlaneseq  ;;  %v1312_v8 = vstv %s1309_s6  ;;  %v1325_v14 = vld [vmem:[%s2174_s4] sm:$0xff] }
 0x241   : > { %v1327_v20 = vcombine.high %v1325_v14, %v1325_v14 }
 0x242   : > { %v1316_v4 = vshrl.u32 %v1315_v3, 7 }
 0x244   : > { %v1307_v5 = vld [vmem:[#allocation2] sm:$0x1f]  ;;  %v1317_v9 = vsub.s32 4, %v1316_v4 }
 0x245   : > { %1819 = vrcp.f32 %v1307_v5 }
 0x246   : > { %v1308_v19 = vld [vmem:[#allocation2 + $0x8] sm:$0x1f] }
 0x247   : > { %1821 = vrcp.f32 %v1308_v19 }
 0x252   : > { %v1820_v10 = vpop.eup %1819 }
 0x253   : > { %v1313_v12 = vmul.f32 %v1820_v10, %v1312_v8 }
 0x254   : > { %v1822_v11 = vpop.eup %1821 }
 0x255   : > { %v1314_v15 = vmul.f32 %v1822_v11, %v1312_v8  ;;  %v1318_v16 = vrot.slane %v1313_v12, %v1317_v9 }
 0x257   : > { %v1322_v17 = vrot.slane %v1314_v15, %v1317_v9  ;;  %v1323_v21 = vmul.f32 %v1318_v16, %v1307_v5 }
 0x259   : > { %v1324_v23 = vmul.f32 %v1322_v17, %v1308_v19  ;;  %v1329_v24 = vadd.f32 %v1325_v14, %v1323_v21 }
 0x25b   : > { %v1330_v25 = vadd.f32 %v1327_v20, %v1324_v23 }
 0x25d   : > { %v1333_v26 = vcombine.low %v1329_v24, %v1330_v25 }
 0x25f   : > { %1335 = vst [vmem:[%s407_s21] sm:$0xff] %v1333_v26 }
 0x260 PF: > { %s1538_s29 = sshll.u32 %s1953_s8, 2  ;;  %s1353_s4 = sshll.u32 %s407_s21, 4  ;;  %s1354_s4 = int_to_ptr.vmem [resolvable:$true] %s1353_s4 }
 0x261   : > { %s1349_s16 = sadd.s32 %s1538_s29, %s2157_s14  ;;  %s2728_s24 = sand.u32 1, %s1937_s27  }
 0x262   : > { %s1539_s9 = sshll.u32 %s1349_s16, 6  ;;  %s1337_s25 = scalar_lea.sflag [#allocation5], %s2728_s24 }
 0x263   : > { %s1351_s17 = scalar_lea.hbm %s2668_s7, %s1539_s9  ;;  %s1853_s22 = scalar_lea.vmem %s1354_s4, 128 }
 0x264   : > { %p1854_p9 = scmp.ne.s32.totalorder %s1354_s4, %s1853_s22  ;;  %p2729_p10 = scmp.ne.s32.totalorder %s2691_s18, 0 }
 0x265   : > { %s1975_s13 = smov [#allocation9]  }
 0x266   : > { %p1855_p13 = pnand %p1854_p9, %p2729_p10  ;;  %s1857_s23 = sshll.u32 %s1975_s13, 4  ;;  %s1858_s23 = int_to_ptr.vmem [resolvable:$false] %s1857_s23 }
 0x267   : > { %s1859_s8 = scalar_lea.vmem %s1858_s23, 256  ;;  %p1860_p2 = scmp.lt.s32.totalorder %s1354_s4, %s1858_s23 }
 0x268   : > { %p1856_p0 = pneg %p1855_p13  ;;  %p1861_p4 = scmp.lt.s32.totalorder %s1859_s8, %s1853_s22 }
 0x26a   : > { %p1862_p5 = por %p1861_p4, %p1860_p2 }
 0x26c   : > { %p1863_p7 = pnand %p1862_p5, %p1856_p0 }
 0x26e   : > { %1866 = shalt.err (!%p1863_p7)
}
 0x26f   : > { %s1867_s19 = scalar_lea.hbm %s1351_s17, 128  ;;  %s1871_s15 = scalar_lea.hbm %s2668_s7, 512 }
 0x270   : > { %p1868_p6 = scmp.ne.s32.totalorder %s1351_s17, %s1867_s19  ;;  %p1872_p12 = scmp.lt.s32.totalorder %s1351_s17, %s2668_s7 }
 0x271   : > { %p1873_p1 = scmp.lt.s32.totalorder %s1871_s15, %s1867_s19 }
 0x272   : > { %p1869_p8 = pnand %p1868_p6, %p2729_p10 }
 0x273   : > { %p1874_p3 = por %p1873_p1, %p1872_p12 }
 0x274   : > { %p1870_p11 = pneg %p1869_p8 }
 0x276   : > { %p1875_p9 = pnand %p1874_p3, %p1870_p11 }
 0x278   : > { %1878 = shalt.err (!%p1875_p9)
}
 0x279   : > { %1586 = dma.vmem_to_hbm [thread:$0]  (%p2729_p10), %s1354_s4, 128, %s1351_s17, %s1337_s25  }
 0x27a PF: > { %s2730_s0 = sld [smem:[#allocation18_spill]]  ;;  %p1603_p13 = scmp.ge.s32.totalorder %s1969_s11, 2 }
 0x27b   : > { %s1365_s6 = sand.u32 1, %s1933_s26  }
 0x27c   : > { %s1366_s29 = scalar_lea.sflag [#allocation5], %s1365_s6 }
 0x280   : > { %p2731_p0 = scmp.ne.s32.totalorder %s2730_s0, 0 }
 0x282   : > { %p1596_p2 = pnand %p1603_p13, %p2731_p0 }
 0x284   : > { %p1597_p4 = pneg %p1596_p2 }
 0x286   : > { %1928 = dma.done.wait (%p1597_p4), %s1366_s29, 128  }
 0x287   : > { %1930 = vsyncadd (%p1597_p4), %s1366_s29, 4294967168  ;;  %s23_s11 = sadd.s32 1, %s1969_s11   ;;  %s2732_s29 = sld [smem:[#allocation13_spill]] }
 0x288   : > { %p20_p5 = scmp.ge.s32.totalorder %s23_s11, 10   ;;  %s2733_s30 = sld [smem:[#allocation14_spill]] }
 0x289   : > { %s2734_s8 = sld [smem:[#allocation15_spill]]  ;;  %s2738_s26 = smov %s1937_s27 }
 0x28a   : > { %s2735_s9 = sld [smem:[#allocation16_spill]]  ;;  %s2739_s27 = smov %s1941_s28 }
 0x28b   : > { %s2736_s10 = sld [smem:[#allocation17_spill]]  ;;  %s2740_s28 = smov %s2124_s20 }
 0x28c   : > { %s2737_s4 = sld [smem:[#allocation19_spill]]  ;;  %22 = sbr.rel (!%p20_p5) target bundleno = 13 (0xd), region = 109 }
 0x291   :  { %1371 = vsyncpa [#allocation5], 1 }
 0x292   :  { %1373 = vsyncpa [#allocation5 + $0x1], 1 }
 0x293   :  { %1374 = vsyncpa [#allocation6], 1 }
 0x294   :  { %1376 = vsyncpa [#allocation6 + $0x1], 1 }
 0x295   :  { %1377 = vsyncpa [#allocation8], 1 }

</bundles_post_ra>
